<compile_context>
chip_gen: v5e
topology: v5e:2x2
jax: 0.10.0
libtpu: 0.0.40
codegen_flags: <defaults>
</compile_context>

<pallas_src>
import math

import jax
import jax.numpy as jnp
from jax.experimental import pallas as pl
from jax.experimental.pallas import tpu as pltpu

_VMEM_BUDGET = 22 * 1024 * 1024   # target for the tile planner
_VMEM_LIMIT = 32 * 1024 * 1024    # scoped VMEM limit communicated to Mosaic


def _round_up(x, m):
    return ((x + m - 1) // m) * m


def _cdiv(a, b):
    return (a + b - 1) // b


# ---------------------------------------------------------------------------
# Kernels
# ---------------------------------------------------------------------------

def _make_kernel(*, k_tiled, apply_threshold, threshold):
    """Fused (x @ W + b) -> sigmoid [-> >= threshold] kernel body."""

    def _finalize(logits, b_ref, o_ref):
        z = logits + b_ref[...]                       # bias broadcast (1, tn)
        z = jnp.clip(z, -30.0, 30.0)                  # sigmoid err < 1e-13
        p = pl.reciprocal(1.0 + jnp.exp(-z), approx=False)   # EUP exp + recip
        if apply_threshold:
            one = jnp.ones_like(p)
            zero = jnp.zeros_like(p)
            o_ref[...] = jnp.where(p >= threshold, one, zero).astype(o_ref.dtype)
        else:
            o_ref[...] = p.astype(o_ref.dtype)

    if not k_tiled:
        def kernel(x_ref, w_ref, b_ref, o_ref):
            x = x_ref[...]
            if x.dtype != w_ref.dtype:                # in-kernel cast (f32->bf16)
                x = x.astype(w_ref.dtype)
            logits = jnp.dot(x, w_ref[...], preferred_element_type=jnp.float32)
            _finalize(logits, b_ref, o_ref)
        return kernel

    def kernel(x_ref, w_ref, b_ref, o_ref, acc_ref):
        k = pl.program_id(2)                          # K axis is innermost

        @pl.when(k == 0)
        def _():
            acc_ref[...] = jnp.zeros_like(acc_ref)

        x = x_ref[...]
        if x.dtype != w_ref.dtype:
            x = x.astype(w_ref.dtype)
        acc_ref[...] += jnp.dot(x, w_ref[...], preferred_element_type=jnp.float32)

        @pl.when(k == pl.num_programs(2) - 1)
        def _():
            _finalize(acc_ref[...], b_ref, o_ref)

    return kernel


# ---------------------------------------------------------------------------
# Tile planning
# ---------------------------------------------------------------------------

def _pick_tm(batch, min_tm):
    """Large batch tile with bounded round-up waste and >= 2 grid steps."""
    tm = min_tm
    for cand in (512, 256, 128, 64, 32, 16, 8):
        if cand < min_tm:
            break
        if _round_up(batch, cand) - batch <= max(batch // 8, 8):
            tm = cand
            break
    # Prefer >= 2 batch grid steps so both v7x TensorCores get work.
    while tm > min_tm and _cdiv(batch, tm) < 2:
        tm = max(min_tm, tm // 2)
    return tm


def _plan_tiles(batch, ent_dim, num_attr, x_bytes, w_bytes, out_bytes):
    # Sublane packing quantum for the (narrow) output dtype.
    min_tm = 32 if out_bytes == 1 else (16 if out_bytes == 2 else 8)
    tm = _pick_tm(batch, min_tm)

    # Single full-width column tile (no padding, W DMA'd once) unless huge.
    tn = num_attr if num_attr <= 1024 else 512

    def need(tm_, tn_, tk_, ktiled):
        bytes_ = (tm_ * tk_ * x_bytes        # x tile
                  + tk_ * tn_ * w_bytes      # W tile
                  + tn_ * 4                  # bias tile
                  + tm_ * tn_ * out_bytes)   # output tile
        return 2 * bytes_ + (tm_ * tn_ * 4 if ktiled else 0)  # 2x double-buf

    # Shrink the column tile only if we are already tiling columns.
    while tn > 128 and tn != num_attr and need(tm, tn, ent_dim, False) > _VMEM_BUDGET:
        tn = max(128, tn // 2)

    # Prefer K-tiling (keeps tm/tn big, MXU fed) over starving the M/N tiles.
    k_tiled = False
    tk = ent_dim
    if need(tm, tn, ent_dim, False) > _VMEM_BUDGET and ent_dim > 128:
        k_tiled = True
        tk = _round_up(min(ent_dim, 2048), 128)
        while tk > 128 and need(tm, tn, tk, True) > _VMEM_BUDGET:
            tk = max(128, _round_up(tk // 2, 128))

    # Last resort: shrink the batch tile.
    while tm > min_tm and need(tm, tn, tk, k_tiled) > _VMEM_BUDGET:
        tm = max(min_tm, tm // 2)

    return tm, tn, tk, k_tiled


# ---------------------------------------------------------------------------
# Fused call
# ---------------------------------------------------------------------------

def _fused_linear_sigmoid(x, w, bias2d, *, threshold=None,
                          out_dtype=jnp.bfloat16):
    """sigmoid(x @ w + bias) (optionally >= threshold) in one pallas_call."""
    batch, ent_dim = x.shape
    ent_dim_w, num_attr = w.shape
    assert ent_dim == ent_dim_w, (x.shape, w.shape)
    assert bias2d.shape == (1, num_attr)

    x_bytes = jnp.dtype(x.dtype).itemsize
    w_bytes = jnp.dtype(w.dtype).itemsize
    out_bytes = jnp.dtype(out_dtype).itemsize

    tm, tn, tk, k_tiled = _plan_tiles(batch, ent_dim, num_attr,
                                      x_bytes, w_bytes, out_bytes)

    if k_tiled:
        kpad = _round_up(ent_dim, tk)
        if kpad != ent_dim:
            # TODO(synk): rare fallback (huge ent_dim not a 128-multiple);
            # zero-pad K so partial K-blocks never feed garbage into the dot.
            x = jnp.pad(x, ((0, 0), (0, kpad - ent_dim)))
            w = jnp.pad(w, ((0, kpad - ent_dim), (0, 0)))
        gk = kpad // tk
    else:
        tk = ent_dim
        gk = 1

    gi = _cdiv(batch, tm)
    gj = _cdiv(num_attr, tn)

    # Order the grid so the operand with the larger total re-fetch cost stays
    # resident across the inner axis (same block index consecutively ->
    # Pallas skips the DMA).
    x_total = batch * ent_dim * x_bytes
    w_total = ent_dim * num_attr * w_bytes
    w_resident = (w_total + gj * x_total) <= (x_total + gi * w_total)

    if k_tiled:
        if w_resident:                      # grid = (j, i, k)
            grid = (gj, gi, gk)
            im_x = lambda j, i, k: (i, k)
            im_w = lambda j, i, k: (k, j)
            im_b = lambda j, i, k: (0, j)
            im_o = lambda j, i, k: (i, j)
        else:                               # grid = (i, j, k)
            grid = (gi, gj, gk)
            im_x = lambda i, j, k: (i, k)
            im_w = lambda i, j, k: (k, j)
            im_b = lambda i, j, k: (0, j)
            im_o = lambda i, j, k: (i, j)
        dims = ("parallel", "parallel", "arbitrary")
        scratch = [pltpu.VMEM((tm, tn), jnp.float32)]
    else:
        if w_resident:                      # grid = (j, i)
            grid = (gj, gi)
            im_x = lambda j, i: (i, 0)
            im_w = lambda j, i: (0, j)
            im_b = lambda j, i: (0, j)
            im_o = lambda j, i: (i, j)
        else:                               # grid = (i, j)
            grid = (gi, gj)
            im_x = lambda i, j: (i, 0)
            im_w = lambda i, j: (0, j)
            im_b = lambda i, j: (0, j)
            im_o = lambda i, j: (i, j)
        dims = ("parallel", "parallel")
        scratch = []

    kernel = _make_kernel(
        k_tiled=k_tiled,
        apply_threshold=threshold is not None,
        threshold=0.0 if threshold is None else float(threshold))

    return pl.pallas_call(
        kernel,
        out_shape=jax.ShapeDtypeStruct((batch, num_attr), out_dtype),
        grid_spec=pltpu.PrefetchScalarGridSpec(
            num_scalar_prefetch=0,
            grid=grid,
            in_specs=[
                pl.BlockSpec((tm, tk), im_x),     # x
                pl.BlockSpec((tk, tn), im_w),     # W
                pl.BlockSpec((1, tn), im_b),      # bias (1, N)
            ],
            out_specs=pl.BlockSpec((tm, tn), im_o),
            scratch_shapes=scratch),
        compiler_params=pltpu.CompilerParams(
            dimension_semantics=dims,
            vmem_limit_bytes=_VMEM_LIMIT),
    )(x, w, bias2d)


# ---------------------------------------------------------------------------
# Module-like wrapper + functional forms
# ---------------------------------------------------------------------------

class RegressionClassifierPallas:
    """Pallas-TPU port of the PyTorch RegressionClassifier module."""

    def __init__(self, weights, bias, threshold=0.77, *,
                 use_bf16=True, out_dtype=jnp.bfloat16,
                 mask_dtype=jnp.float32):
        ent_dim, num_attr = weights.shape
        self.ent_dim = ent_dim
        self.num_attr = num_attr
        self.threshold = float(threshold)
        self.out_dtype = out_dtype
        self.mask_dtype = mask_dtype
        param_dtype = jnp.bfloat16 if use_bf16 else jnp.float32
        # Parameters are prepared ONCE (cast + bias reshape) so the per-call
        # hot path has no pad/astype passes over them.
        self.weights = jnp.asarray(weights).astype(param_dtype)
        self.bias2d = jnp.asarray(bias).astype(jnp.float32).reshape(1, num_attr)

    def forward(self, x):
        return _fused_linear_sigmoid(x, self.weights, self.bias2d,
                                     threshold=None, out_dtype=self.out_dtype)

    __call__ = forward

    def predict(self, x):
        # Fused threshold: compare happens in VMEM; kernel writes the 0/1
        # mask directly (no second HBM pass over the probabilities).
        return _fused_linear_sigmoid(x, self.weights, self.bias2d,
                                     threshold=self.threshold,
                                     out_dtype=self.mask_dtype)


def regression_classifier_forward(x, weights, bias, *, use_bf16=True,
                                  out_dtype=jnp.bfloat16):
    """One-shot functional form (casts W per call; prefer the class)."""
    param_dtype = jnp.bfloat16 if use_bf16 else jnp.float32
    w = jnp.asarray(weights).astype(param_dtype)
    b2 = jnp.asarray(bias).astype(jnp.float32).reshape(1, -1)
    return _fused_linear_sigmoid(x, w, b2, threshold=None, out_dtype=out_dtype)


def regression_classifier_predict(x, weights, bias, threshold=0.77, *,
                                  use_bf16=True, mask_dtype=jnp.float32):
    param_dtype = jnp.bfloat16 if use_bf16 else jnp.float32
    w = jnp.asarray(weights).astype(param_dtype)
    b2 = jnp.asarray(bias).astype(jnp.float32).reshape(1, -1)
    return _fused_linear_sigmoid(x, w, b2, threshold=threshold,
                                 out_dtype=mask_dtype)


def xavier_uniform(key, shape, dtype=jnp.float32):
    """Match torch.nn.init.xavier_uniform_ for a 2-D tensor."""
    fan_in, fan_out = shape
    limit = math.sqrt(6.0 / (fan_in + fan_out))
    return jax.random.uniform(key, shape, dtype=dtype, minval=-limit, maxval=limit)


if __name__ == "__main__":
    key = jax.random.PRNGKey(0)
    k_x, k_w = jax.random.split(key)

    batch, ent_dim, num_attr = 16, 32, 8

    x = jax.random.normal(k_x, (batch, ent_dim), dtype=jnp.float32)
    weights = xavier_uniform(k_w, (ent_dim, num_attr))
    bias = jnp.zeros((num_attr,), dtype=jnp.float32)   # matches torch.zeros init

    clf = RegressionClassifierPallas(weights, bias, threshold=0.77)

    probs = jax.block_until_ready(clf.forward(x))
    preds = jax.block_until_ready(clf.predict(x))

    # Pure-JAX f32 reference.
    ref_probs = jax.nn.sigmoid(x @ weights + bias)
    ref_preds = (ref_probs >= 0.77).astype(jnp.float32)

    assert probs.shape == (batch, num_attr) and probs.dtype == jnp.bfloat16
    assert preds.shape == (batch, num_attr) and preds.dtype == jnp.float32
    err = float(jnp.max(jnp.abs(probs.astype(jnp.float32) - ref_probs)))
    assert err < 1e-2, err
    # bf16 matmul can only flip classes within ~1e-2 of the threshold.
    near = jnp.abs(ref_probs - 0.77) < 1e-2
    assert bool(jnp.all(jnp.where(near, True, preds == ref_preds))), "mask mismatch"

    print("KERNEL_OK")
</pallas_src>

<mosaic_0001>
module attributes {stable_mosaic.version = 11 : i64} {
  func.func @kernel(%arg0: i32, %arg1: i32, %arg2: memref<16x32xf32, #tpu.memory_space<vmem>>, %arg3: memref<32x8xbf16, #tpu.memory_space<vmem>>, %arg4: memref<1x8xf32, #tpu.memory_space<vmem>>, %arg5: memref<16x8xbf16, #tpu.memory_space<vmem>>) attributes {dimension_semantics = [#tpu.dimension_semantics<parallel>, #tpu.dimension_semantics<parallel>], iteration_bounds = array<i64: 1, 1>, scalar_prefetch = 0 : i64, scratch_operands = 0 : i64, tpu.core_type = #tpu.core_type<tc>, window_params = [{transform_indices = @transform_0, window_bounds = array<i64: 16, 32>}, {transform_indices = @transform_1, window_bounds = array<i64: 32, 8>}, {transform_indices = @transform_2, window_bounds = array<i64: 1, 8>}, {transform_indices = @transform_3, window_bounds = array<i64: 16, 8>}]} {
    %c0 = arith.constant 0 : index
    %c0_0 = arith.constant 0 : index
    %0 = vector.load %arg2[%c0, %c0_0] : memref<16x32xf32, #tpu.memory_space<vmem>>, vector<16x32xf32>
    %1 = arith.truncf %0 : vector<16x32xf32> to vector<16x32xbf16>
    %c0_1 = arith.constant 0 : index
    %c0_2 = arith.constant 0 : index
    %2 = vector.load %arg3[%c0_1, %c0_2] : memref<32x8xbf16, #tpu.memory_space<vmem>>, vector<32x8xbf16>
    %cst = arith.constant dense<0.000000e+00> : vector<16x8xf32>
    %3 = tpu.matmul %1, %2, %cst {dimension_numbers = #tpu.dot_dimension_numbers<[1], [0], [0], [1], [0, 0, 1, 1], [], []>} : vector<16x32xbf16>, vector<32x8xbf16>, vector<16x8xf32> -> vector<16x8xf32>
    %c0_3 = arith.constant 0 : index
    %c0_4 = arith.constant 0 : index
    %4 = vector.load %arg4[%c0_3, %c0_4] : memref<1x8xf32, #tpu.memory_space<vmem>>, vector<1x8xf32>
    %5 = vector.broadcast %4 : vector<1x8xf32> to vector<16x8xf32>
    %6 = arith.addf %3, %5 : vector<16x8xf32>
    %cst_5 = arith.constant -3.000000e+01 : f32
    %cst_6 = arith.constant 3.000000e+01 : f32
    %7 = vector.broadcast %cst_5 : f32 to vector<16x8xf32>
    %8 = arith.maximumf %7, %6 : vector<16x8xf32>
    %9 = vector.broadcast %cst_6 : f32 to vector<16x8xf32>
    %10 = arith.minimumf %9, %8 : vector<16x8xf32>
    %cst_7 = arith.constant 0.000000e+00 : f32
    %11 = vector.broadcast %cst_7 : f32 to vector<16x8xf32>
    %12 = arith.subf %11, %10 : vector<16x8xf32>
    %13 = math.exp %12 : vector<16x8xf32>
    %cst_8 = arith.constant 1.000000e+00 : f32
    %14 = vector.broadcast %cst_8 : f32 to vector<16x8xf32>
    %15 = arith.addf %14, %13 : vector<16x8xf32>
    %16 = tpu.reciprocal %15 : vector<16x8xf32> -> vector<16x8xf32>
    %17 = arith.truncf %16 : vector<16x8xf32> to vector<16x8xbf16>
    %c0_9 = arith.constant 0 : index
    %c0_10 = arith.constant 0 : index
    %18 = vector.load %arg5[%c0_9, %c0_10] : memref<16x8xbf16, #tpu.memory_space<vmem>>, vector<16x8xbf16>
    tpu.vector_store %arg5[%c0_9, %c0_10], %17 {strides = array<i32>} : memref<16x8xbf16, #tpu.memory_space<vmem>>, vector<16x8xbf16>,
    return
  }
  func.func @transform_0(%arg0: i32, %arg1: i32) -> (i32, i32) {
    %c0_i32 = arith.constant 0 : i32
    %c0_i32_0 = arith.constant 0 : i32
    return %arg1, %c0_i32 : i32, i32
  }
  func.func @transform_1(%arg0: i32, %arg1: i32) -> (i32, i32) {
    %c0_i32 = arith.constant 0 : i32
    %c0_i32_0 = arith.constant 0 : i32
    return %c0_i32, %arg0 : i32, i32
  }
  func.func @transform_2(%arg0: i32, %arg1: i32) -> (i32, i32) {
    %c0_i32 = arith.constant 0 : i32
    %c0_i32_0 = arith.constant 0 : i32
    return %c0_i32, %arg0 : i32, i32
  }
  func.func @transform_3(%arg0: i32, %arg1: i32) -> (i32, i32) {
    %c0_i32 = arith.constant 0 : i32
    return %arg1, %arg0 : i32, i32
  }
}

</mosaic_0001>

<bundles_post_ra>
// kernel: tpu_custom_call.1
= control target key start
LH: loop header
LB: loop body
LE: loop exit
PB: predicated region body
PF: predicated region fallthrough
CT: control target
= control target key end

     0   :  { %vm38_vm0 = vcmask 261120   ;;  %vm98_vm5 = vcmask 60416   ;;  %s170_s1 = inlined_call_operand.vmem [shape: bf16[32,8], index: 1, kind: input, shape index: {}]   ;;  %s171_s0 = inlined_call_operand.vmem [shape: f32[16,32], index: 0, kind: input, shape index: {}]   ;;  %s172_s2 = inlined_call_operand.vmem [shape: f32[1,8], index: 2, kind: input, shape index: {}]   ;;  %s173_s3 = inlined_call_operand.vmem [shape: bf16[16,8], index: 3, kind: output, shape index: {}]  }
   0x1   :  { %v117_v0 = vld [vmem:[%s170_s1 + $0x8] sm:$0xff]  ;;  %v116_v1 = vld [vmem:[%s170_s1] sm:$0xff] }
   0x2   :  { %48 = vmatpush.bf16.msra.mxu0 %v117_v0  ;;  %v15_v2 = vld [vmem:[%s171_s0] sm:$0xff]  ;;  %v16_v3 = vld [vmem:[%s171_s0 + $0x8] sm:$0xff] }
   0x3   :  { %v17_v4 = vpack.c.bf16 %v16_v3, %v15_v2  ;;  %v118_v5 = vld [vmem:[%s172_s2] ss:$0 sm:$0xff] }
   0x6   :  { %49 = vmatpush.bf16.msra.mxu0 %v116_v1 }
   0x9   :  { %113 = vmatmul.msk.bf16.vlgmr.msra.gmra.mxu0 %vm38_vm0, %v17_v4 }
  0x86   :  { %v51_v6 = vpop.f32.mrf.mxu0 }
  0x87   :  { %v52_v7 = vadd.f32 %v118_v5, %v51_v6 }
  0x89   :  { %v114_v8 = vclamps-f32 %v52_v7, 30.0 }
  0x8b   :  { %v60_v9 = vsub.f32 0.0, %v114_v8 }
  0x8d   :  { %v62_v10 = vmul.f32 1.442695, %v60_v9 }
  0x8e   :  { %v53_v11 = vpop.f32.mrf.mxu0 }
  0x8f   :  { %119 = vpow2.f32 %v62_v10  ;;  %v54_v12 = vadd.f32 %v118_v5, %v53_v11 }
  0x91   :  { %v115_v13 = vclamps-f32 %v54_v12, 30.0 }
  0x93   :  { %v61_v14 = vsub.f32 0.0, %v115_v13 }
  0x95   :  { %v120_v15 = vpop.eup %119  ;;  %v64_v16 = vmul.f32 1.442695, %v61_v14 }
  0x96   :  { %v66_v17 = vadd.f32 1.0, %v120_v15 }
  0x97   :  { %121 = vpow2.f32 %v64_v16 }
  0x98   :  { %123 = vrcp.f32 %v66_v17  ;;  %v79_v23 = vand.u32 2147483648, %v66_v17  ;;  %v77_v25 = vand.u32 2147483647, %v66_v17  ;;  %vm73_vm2 = vweird.f32 %v66_v17 }
  0x9a   :  { %v80_v28 = vor.u32 1.1754944e-38, %v79_v23  ;;  %vm78_vm4 = vcmp.eq.f32.partialorder %v77_v25, 8.507059e+37 }
  0x9d   :  { %v122_v18 = vpop.eup %121 }
  0x9e   :  { %v124_v19 = vpop.eup %123  ;;  %v67_v20 = vadd.f32 1.0, %v122_v18 }
  0x9f   :  { %v69_v21 = vmul.f32 %v124_v19, %v66_v17  ;;  %vm74_vm1 = vweird.f32 %v124_v19 }
  0xa0   :  { %125 = vrcp.f32 %v67_v20  ;;  %vm75_vm3 = vmor %vm73_vm2, %vm74_vm1  ;;  %v93_v34 = vand.u32 2147483648, %v67_v20  ;;  %v91_v36 = vand.u32 2147483647, %v67_v20  ;;  %vm87_vm7 = vweird.f32 %v67_v20 }
  0xa1   :  { %v70_v22 = vsub.f32 1.0, %v69_v21 }
  0xa2   :  { %v94_v38 = vor.u32 1.1754944e-38, %v93_v34  ;;  %vm92_vm9 = vcmp.eq.f32.partialorder %v91_v36, 8.507059e+37 }
  0xa3   :  { %v71_v24 = vmul.f32 %v124_v19, %v70_v22 }
  0xa5   :  { %v72_v26 = vadd.f32 %v124_v19, %v71_v24 }
  0xa6   :  { %v126_v27 = vpop.eup %125 }
  0xa7   :  { %v76_v29 = vsel %vm75_vm3, %v124_v19, %v72_v26  ;;  %v83_v30 = vmul.f32 %v126_v27, %v67_v20  ;;  %vm88_vm6 = vweird.f32 %v126_v27 }
  0xa8   :  { %v81_v31 = vsel %vm78_vm4, %v80_v28, %v76_v29  ;;  %vm89_vm8 = vmor %vm87_vm7, %vm88_vm6 }
  0xa9   :  { %v96_v32 = vpack.c.bf16 %v81_v31, %v81_v31  ;;  %v84_v33 = vsub.f32 1.0, %v83_v30 }
  0xab   :  { %99 = vst.msk [vmem:[%s173_s3] sm:$0xf] %vm98_vm5, %v96_v32  ;;  %v85_v35 = vmul.f32 %v126_v27, %v84_v33 }
  0xad   :  { %v86_v37 = vadd.f32 %v126_v27, %v85_v35 }
  0xaf   :  { %v90_v39 = vsel %vm89_vm8, %v126_v27, %v86_v37 }
  0xb0   :  { %v95_v40 = vsel %vm92_vm9, %v94_v38, %v90_v39 }
  0xb1   :  { %v97_v41 = vpack.c.bf16 %v95_v40, %v95_v40 }
  0xb3   :  { %100 = vst.msk [vmem:[%s173_s3 + $0x4] sm:$0xf] %vm98_vm5, %v97_v41 }

</bundles_post_ra>
